<compile_context>
chip_gen: v7x
topology: tpu7x:2x2x1
jax: 0.10.0
libtpu: 0.0.40
codegen_flags: <defaults>
</compile_context>

<pallas_src>
import jax
import jax.numpy as jnp
from jax.experimental import pallas as pl
from jax.experimental.pallas import tpu as pltpu


def _round_up(x, m):
    return ((x + m - 1) // m) * m


def _tpu_vmem_bytes():
    """Physical VMEM per core (generation-aware, with safe fallbacks)."""
    try:
        info = pltpu.get_tpu_info()
        v = getattr(info, "vmem_capacity_bytes", None)
        if v:
            return int(v)
    except Exception:
        pass
    try:
        kind = jax.devices()[0].device_kind.lower()
    except Exception:
        kind = ""
    if "v7" in kind:
        return 64 * 1024 * 1024
    return 128 * 1024 * 1024


# ---------------------------------------------------------------------------
# Kernels
# ---------------------------------------------------------------------------

def _mlp_kernel_resident(x_ref, w1_ref, b1_ref, w2_ref, b2_ref, out_ref):
    """Both weight matrices VMEM-resident; batch tiles stream through."""
    x = x_ref[...].astype(jnp.bfloat16)                       # streamed tile
    h = jnp.dot(x, w1_ref[...], preferred_element_type=jnp.float32)
    h = jnp.maximum(h + b1_ref[...], 0.0)                     # f32 bias + ReLU
    y = jnp.dot(h.astype(jnp.bfloat16), w2_ref[...],
                preferred_element_type=jnp.float32)
    out_ref[...] = (y + b2_ref[...]).astype(out_ref.dtype)


def _mlp_kernel_ktiled(x_ref, w1_ref, b1_ref, w2_ref, b2_ref, out_ref, acc_ref):
    """W1 streamed along K with an f32 accumulator; W2 stays resident."""
    k = pl.program_id(1)

    @pl.when(k == 0)
    def _():
        acc_ref[...] = jnp.zeros_like(acc_ref)

    acc_ref[...] += jnp.dot(x_ref[...].astype(jnp.bfloat16), w1_ref[...],
                            preferred_element_type=jnp.float32)

    @pl.when(k == pl.num_programs(1) - 1)
    def _():
        h = jnp.maximum(acc_ref[...] + b1_ref[...], 0.0)
        y = jnp.dot(h.astype(jnp.bfloat16), w2_ref[...],
                    preferred_element_type=jnp.float32)
        out_ref[...] = (y + b2_ref[...]).astype(out_ref.dtype)


# ---------------------------------------------------------------------------
# Wrapper
# ---------------------------------------------------------------------------

def _jnp_forward(x, w1, b1_2d, w2, b2_2d):
    h = jnp.maximum(x @ w1 + b1_2d, 0.0)
    return h @ w2 + b2_2d


def linear_net_forward(x, w1, b1, w2, b2, *, block_batch=None, block_k=512,
                       use_pallas=None, force_k_tiling=False):
    """Forward pass of Linear_Net.

    x: (B, input_size); w1: (input_size, hidden); b1: (hidden,);
    w2: (hidden, output_size); b2: (output_size,).
    Weights are stored transposed relative to PyTorch (in_features, out_features).
    """
    B, in_size = x.shape
    hid = w1.shape[1]
    out_size = w2.shape[1]
    b1_2d = jnp.asarray(b1).reshape(1, -1)
    b2_2d = jnp.asarray(b2).reshape(1, -1)

    # Tiny problems: the Pallas call is pure fixed overhead; XLA's fused dot wins.
    if use_pallas is None:
        use_pallas = B * (in_size * hid + hid * out_size) >= (1 << 22)
    if not use_pallas:
        return _jnp_forward(x, w1, b1_2d, w2, b2_2d)

    # --- generation-aware VMEM budget / batch tile ---------------------------
    vmem_phys = _tpu_vmem_bytes()
    vmem_limit = int(max(32 << 20, min(vmem_phys * 0.85, vmem_phys - (8 << 20))))
    budget = int(vmem_limit * 0.9)

    if block_batch is None:
        block_batch = 512 if vmem_phys > (96 << 20) else 256

    gran = 16 if B >= 16 else 8           # bf16 packs 16 sublanes per vreg
    tb = min(_round_up(block_batch, gran), _round_up(B, gran))
    if vmem_phys <= (64 << 20) and B >= 2 * gran:
        # >= 2 grid steps so both v7x TensorCores get work under "parallel".
        tb = min(tb, _round_up(-(-B // 2), gran))

    # Resident-path VMEM estimate: bf16 weights (single-buffered) + f32 biases,
    # double-buffered x/out tiles, f32 h plus its bf16 copy.
    w_res_bytes = 2 * (in_size * hid + hid * out_size) + 4 * (hid + out_size)

    def _transient(t):
        return t * (2 * 4 * in_size + 4 * hid + 2 * hid + 2 * 4 * out_size)

    while tb > gran and w_res_bytes + _transient(tb) > budget:
        tb = max(gran, _round_up(tb // 2, gran))
    k_tiled = force_k_tiling or (w_res_bytes + _transient(tb) > budget)

    # --- minimal padding: batch only (feature dims use full-extent blocks) ----
    b_p = _round_up(B, tb)
    x_p = x if b_p == B else jnp.pad(x, ((0, b_p - B), (0, 0)))

    # Pre-cast weights to bf16 once (halves weight DMA + residency).
    w1_bf = w1.astype(jnp.bfloat16)
    w2_bf = w2.astype(jnp.bfloat16)

    compiler_params = lambda sem: pltpu.CompilerParams(
        dimension_semantics=sem, vmem_limit_bytes=vmem_limit)

    if not k_tiled:
        def _call(single_buffer):
            def wspec(shape):
                if single_buffer:
                    return pl.BlockSpec(shape, lambda i: (0, 0),
                                        pipeline_mode=pl.Buffered(1))
                return pl.BlockSpec(shape, lambda i: (0, 0))
            grid_spec = pltpu.PrefetchScalarGridSpec(
                num_scalar_prefetch=0,
                grid=(b_p // tb,),
                in_specs=[
                    pl.BlockSpec((tb, in_size), lambda i: (i, 0)),  # x streamed
                    wspec((in_size, hid)),                          # W1 resident
                    wspec((1, hid)),                                # b1 resident
                    wspec((hid, out_size)),                         # W2 resident
                    wspec((1, out_size)),                           # b2 resident
                ],
                # Output kept at the exact feature width (full-extent block) to
                # avoid a wrapper-side feature-slice HBM pass.
                out_specs=pl.BlockSpec((tb, out_size), lambda i: (i, 0)),
            )
            return pl.pallas_call(
                _mlp_kernel_resident,
                out_shape=jax.ShapeDtypeStruct((b_p, out_size), x.dtype),
                grid_spec=grid_spec,
                compiler_params=compiler_params(("parallel",)),
            )(x_p, w1_bf, b1_2d, w2_bf, b2_2d)
    else:
        # K-tiled path: stream W1 along the contraction dim, accumulate in f32.
        tk = min(_round_up(block_k, 128), _round_up(in_size, 128))
        k_p = _round_up(in_size, tk)
        if k_p != in_size:
            x_p = jnp.pad(x_p, ((0, 0), (0, k_p - in_size)))
            w1_bf = jnp.pad(w1_bf, ((0, k_p - in_size), (0, 0)))

        def _call(single_buffer):
            def wspec(shape):
                if single_buffer:
                    return pl.BlockSpec(shape, lambda i, k: (0, 0),
                                        pipeline_mode=pl.Buffered(1))
                return pl.BlockSpec(shape, lambda i, k: (0, 0))
            grid_spec = pltpu.PrefetchScalarGridSpec(
                num_scalar_prefetch=0,
                grid=(b_p // tb, k_p // tk),
                in_specs=[
                    pl.BlockSpec((tb, tk), lambda i, k: (i, k)),   # x tile
                    pl.BlockSpec((tk, hid), lambda i, k: (k, 0)),  # W1 K-tile
                    wspec((1, hid)),
                    wspec((hid, out_size)),
                    wspec((1, out_size)),
                ],
                out_specs=pl.BlockSpec((tb, out_size), lambda i, k: (i, 0)),
                scratch_shapes=[pltpu.VMEM((tb, hid), jnp.float32)],
            )
            return pl.pallas_call(
                _mlp_kernel_ktiled,
                out_shape=jax.ShapeDtypeStruct((b_p, out_size), x.dtype),
                grid_spec=grid_spec,
                compiler_params=compiler_params(("parallel", "arbitrary")),
            )(x_p, w1_bf, b1_2d, w2_bf, b2_2d)

    try:
        out = _call(True)
    except Exception:
        # Fallback if single-buffered (Buffered(1)) block specs are unsupported.
        out = _call(False)

    return out if b_p == B else out[:B]


# ---------------------------------------------------------------------------
# Params / references / test
# ---------------------------------------------------------------------------

def init_params(key, input_size, hidden_size, output_size, dtype=jnp.float32):
    # Mirrors nn.Linear's uniform(-1/sqrt(fan_in), 1/sqrt(fan_in)) init.
    k1, k2, k3, k4 = jax.random.split(key, 4)
    bound1 = 1.0 / float(input_size) ** 0.5
    bound2 = 1.0 / float(hidden_size) ** 0.5
    # Stored transposed relative to PyTorch: (in_features, out_features).
    w1 = jax.random.uniform(k1, (input_size, hidden_size), dtype, -bound1, bound1)
    b1 = jax.random.uniform(k2, (hidden_size,), dtype, -bound1, bound1)
    w2 = jax.random.uniform(k3, (hidden_size, output_size), dtype, -bound2, bound2)
    b2 = jax.random.uniform(k4, (output_size,), dtype, -bound2, bound2)
    return w1, b1, w2, b2


def _reference_bf16(x, w1, b1, w2, b2):
    # Same numerics as the kernel: bf16 matmul operands, f32 accumulation,
    # f32 bias-add / ReLU.
    h = jnp.dot(x.astype(jnp.bfloat16), w1.astype(jnp.bfloat16),
                preferred_element_type=jnp.float32) + b1.reshape(1, -1)
    h = jnp.maximum(h, 0.0)
    return jnp.dot(h.astype(jnp.bfloat16), w2.astype(jnp.bfloat16),
                   preferred_element_type=jnp.float32) + b2.reshape(1, -1)


if __name__ == "__main__":
    key = jax.random.PRNGKey(0)
    kx1, kp1, kx2, kp2 = jax.random.split(key, 4)

    # ---- Test 1: small shapes, resident-weight path (forced through Pallas).
    input_size, hidden_size, output_size, batch = 32, 64, 16, 8
    x = jax.random.normal(kx1, (batch, input_size), jnp.float32)
    w1, b1, w2, b2 = init_params(kp1, input_size, hidden_size, output_size)

    out = jax.block_until_ready(
        linear_net_forward(x, w1, b1, w2, b2, use_pallas=True))
    assert out.shape == (batch, output_size)

    ref_bf16 = _reference_bf16(x, w1, b1, w2, b2)
    assert jnp.allclose(out, ref_bf16, atol=2e-3, rtol=2e-3), "mismatch vs bf16 ref"
    ref_f32 = jnp.maximum(x @ w1 + b1.reshape(1, -1), 0.0) @ w2 + b2.reshape(1, -1)
    assert jnp.allclose(out, ref_f32, atol=5e-2, rtol=5e-2), "mismatch vs f32 ref"

    # ---- Test 2: K-tiled accumulator path (forced with a small K tile),
    #      batch not a multiple of the tile -> exercises batch pad/slice.
    in2, hid2, out2, batch2 = 256, 128, 64, 48
    x2 = jax.random.normal(kx2, (batch2, in2), jnp.float32)
    w1b, b1b, w2b, b2b = init_params(kp2, in2, hid2, out2)

    out_k = jax.block_until_ready(
        linear_net_forward(x2, w1b, b1b, w2b, b2b, use_pallas=True,
                           force_k_tiling=True, block_k=128))
    assert out_k.shape == (batch2, out2)
    ref_k = _reference_bf16(x2, w1b, b1b, w2b, b2b)
    assert jnp.allclose(out_k, ref_k, atol=2e-3, rtol=2e-3), "mismatch (K-tiled)"

    # ---- Test 3: auto-dispatch sends the tiny problem to plain XLA.
    out_auto = jax.block_until_ready(linear_net_forward(x, w1, b1, w2, b2))
    assert jnp.allclose(out_auto, ref_f32, atol=1e-4, rtol=1e-4), "auto path mismatch"

    print("KERNEL_OK")
</pallas_src>

<mosaic_0001>
module attributes {stable_mosaic.version = 11 : i64} {
  func.func @_mlp_kernel_resident(%arg0: i32, %arg1: memref<8x32xf32, #tpu.memory_space<vmem>>, %arg2: memref<32x64xbf16, #tpu.memory_space<vmem>>, %arg3: memref<1x64xf32, #tpu.memory_space<vmem>>, %arg4: memref<64x16xbf16, #tpu.memory_space<vmem>>, %arg5: memref<1x16xf32, #tpu.memory_space<vmem>>, %arg6: memref<8x16xf32, #tpu.memory_space<vmem>>) attributes {dimension_semantics = [#tpu.dimension_semantics<parallel>], iteration_bounds = array<i64: 1>, scalar_prefetch = 0 : i64, scratch_operands = 0 : i64, tpu.core_type = #tpu.core_type<tc>, window_params = [{transform_indices = @transform_0, window_bounds = array<i64: 8, 32>}, {pipeline_mode = #tpu.pipeline_mode<synchronous>, transform_indices = @transform_1, window_bounds = array<i64: 32, 64>}, {pipeline_mode = #tpu.pipeline_mode<synchronous>, transform_indices = @transform_2, window_bounds = array<i64: 1, 64>}, {pipeline_mode = #tpu.pipeline_mode<synchronous>, transform_indices = @transform_3, window_bounds = array<i64: 64, 16>}, {pipeline_mode = #tpu.pipeline_mode<synchronous>, transform_indices = @transform_4, window_bounds = array<i64: 1, 16>}, {transform_indices = @transform_5, window_bounds = array<i64: 8, 16>}]} {
    %c0 = arith.constant 0 : index
    %c0_0 = arith.constant 0 : index
    %0 = vector.load %arg1[%c0, %c0_0] : memref<8x32xf32, #tpu.memory_space<vmem>>, vector<8x32xf32>
    %1 = arith.truncf %0 : vector<8x32xf32> to vector<8x32xbf16>
    %c0_1 = arith.constant 0 : index
    %c0_2 = arith.constant 0 : index
    %2 = vector.load %arg2[%c0_1, %c0_2] : memref<32x64xbf16, #tpu.memory_space<vmem>>, vector<32x64xbf16>
    %cst = arith.constant dense<0.000000e+00> : vector<8x64xf32>
    %3 = tpu.matmul %1, %2, %cst {dimension_numbers = #tpu.dot_dimension_numbers<[1], [0], [0], [1], [0, 0, 1, 1], [], []>} : vector<8x32xbf16>, vector<32x64xbf16>, vector<8x64xf32> -> vector<8x64xf32>
    %c0_3 = arith.constant 0 : index
    %c0_4 = arith.constant 0 : index
    %4 = vector.load %arg3[%c0_3, %c0_4] : memref<1x64xf32, #tpu.memory_space<vmem>>, vector<1x64xf32>
    %5 = vector.broadcast %4 : vector<1x64xf32> to vector<8x64xf32>
    %6 = arith.addf %3, %5 : vector<8x64xf32>
    %cst_5 = arith.constant 0.000000e+00 : f32
    %7 = vector.broadcast %cst_5 : f32 to vector<8x64xf32>
    %8 = arith.maximumf %6, %7 : vector<8x64xf32>
    %9 = arith.truncf %8 : vector<8x64xf32> to vector<8x64xbf16>
    %c0_6 = arith.constant 0 : index
    %c0_7 = arith.constant 0 : index
    %10 = vector.load %arg4[%c0_6, %c0_7] : memref<64x16xbf16, #tpu.memory_space<vmem>>, vector<64x16xbf16>
    %cst_8 = arith.constant dense<0.000000e+00> : vector<8x16xf32>
    %11 = tpu.matmul %9, %10, %cst_8 {dimension_numbers = #tpu.dot_dimension_numbers<[1], [0], [0], [1], [0, 0, 1, 1], [], []>} : vector<8x64xbf16>, vector<64x16xbf16>, vector<8x16xf32> -> vector<8x16xf32>
    %c0_9 = arith.constant 0 : index
    %c0_10 = arith.constant 0 : index
    %12 = vector.load %arg5[%c0_9, %c0_10] : memref<1x16xf32, #tpu.memory_space<vmem>>, vector<1x16xf32>
    %13 = vector.broadcast %12 : vector<1x16xf32> to vector<8x16xf32>
    %14 = arith.addf %11, %13 : vector<8x16xf32>
    %c0_11 = arith.constant 0 : index
    %c0_12 = arith.constant 0 : index
    %15 = vector.load %arg6[%c0_11, %c0_12] : memref<8x16xf32, #tpu.memory_space<vmem>>, vector<8x16xf32>
    tpu.vector_store %arg6[%c0_11, %c0_12], %14 {strides = array<i32>} : memref<8x16xf32, #tpu.memory_space<vmem>>, vector<8x16xf32>,
    return
  }
  func.func @transform_0(%arg0: i32) -> (i32, i32) {
    %c0_i32 = arith.constant 0 : i32
    %c0_i32_0 = arith.constant 0 : i32
    return %arg0, %c0_i32 : i32, i32
  }
  func.func @transform_1(%arg0: i32) -> (i32, i32) {
    %c0_i32 = arith.constant 0 : i32
    %c0_i32_0 = arith.constant 0 : i32
    %c0_i32_1 = arith.constant 0 : i32
    return %c0_i32, %c0_i32_0 : i32, i32
  }
  func.func @transform_2(%arg0: i32) -> (i32, i32) {
    %c0_i32 = arith.constant 0 : i32
    %c0_i32_0 = arith.constant 0 : i32
    %c0_i32_1 = arith.constant 0 : i32
    return %c0_i32, %c0_i32_0 : i32, i32
  }
  func.func @transform_3(%arg0: i32) -> (i32, i32) {
    %c0_i32 = arith.constant 0 : i32
    %c0_i32_0 = arith.constant 0 : i32
    %c0_i32_1 = arith.constant 0 : i32
    return %c0_i32, %c0_i32_0 : i32, i32
  }
  func.func @transform_4(%arg0: i32) -> (i32, i32) {
    %c0_i32 = arith.constant 0 : i32
    %c0_i32_0 = arith.constant 0 : i32
    %c0_i32_1 = arith.constant 0 : i32
    return %c0_i32, %c0_i32_0 : i32, i32
  }
  func.func @transform_5(%arg0: i32) -> (i32, i32) {
    %c0_i32 = arith.constant 0 : i32
    %c0_i32_0 = arith.constant 0 : i32
    return %arg0, %c0_i32 : i32, i32
  }
}

module attributes {stable_mosaic.version = 11 : i64} {
  func.func @_mlp_kernel_resident(%arg0: i32, %arg1: memref<8x32xf32, #tpu.memory_space<vmem>>, %arg2: memref<32x64xbf16, #tpu.memory_space<vmem>>, %arg3: memref<1x64xf32, #tpu.memory_space<vmem>>, %arg4: memref<64x16xbf16, #tpu.memory_space<vmem>>, %arg5: memref<1x16xf32, #tpu.memory_space<vmem>>, %arg6: memref<8x16xf32, #tpu.memory_space<vmem>>) attributes {dimension_semantics = [#tpu.dimension_semantics<parallel>], iteration_bounds = array<i64: 1>, scalar_prefetch = 0 : i64, scratch_operands = 0 : i64, tpu.core_type = #tpu.core_type<tc>, window_params = [{transform_indices = @transform_0, window_bounds = array<i64: 8, 32>}, {pipeline_mode = #tpu.pipeline_mode<synchronous>, transform_indices = @transform_1, window_bounds = array<i64: 32, 64>}, {pipeline_mode = #tpu.pipeline_mode<synchronous>, transform_indices = @transform_2, window_bounds = array<i64: 1, 64>}, {pipeline_mode = #tpu.pipeline_mode<synchronous>, transform_indices = @transform_3, window_bounds = array<i64: 64, 16>}, {pipeline_mode = #tpu.pipeline_mode<synchronous>, transform_indices = @transform_4, window_bounds = array<i64: 1, 16>}, {transform_indices = @transform_5, window_bounds = array<i64: 8, 16>}]} {
    %c0 = arith.constant 0 : index
    %c0_0 = arith.constant 0 : index
    %0 = vector.load %arg1[%c0, %c0_0] : memref<8x32xf32, #tpu.memory_space<vmem>>, vector<8x32xf32>
    %1 = arith.truncf %0 : vector<8x32xf32> to vector<8x32xbf16>
    %c0_1 = arith.constant 0 : index
    %c0_2 = arith.constant 0 : index
    %2 = vector.load %arg2[%c0_1, %c0_2] : memref<32x64xbf16, #tpu.memory_space<vmem>>, vector<32x64xbf16>
    %cst = arith.constant dense<0.000000e+00> : vector<8x64xf32>
    %3 = tpu.matmul %1, %2, %cst {dimension_numbers = #tpu.dot_dimension_numbers<[1], [0], [0], [1], [0, 0, 1, 1], [], []>} : vector<8x32xbf16>, vector<32x64xbf16>, vector<8x64xf32> -> vector<8x64xf32>
    %c0_3 = arith.constant 0 : index
    %c0_4 = arith.constant 0 : index
    %4 = vector.load %arg3[%c0_3, %c0_4] : memref<1x64xf32, #tpu.memory_space<vmem>>, vector<1x64xf32>
    %5 = vector.broadcast %4 : vector<1x64xf32> to vector<8x64xf32>
    %6 = arith.addf %3, %5 : vector<8x64xf32>
    %cst_5 = arith.constant 0.000000e+00 : f32
    %7 = vector.broadcast %cst_5 : f32 to vector<8x64xf32>
    %8 = arith.maximumf %6, %7 : vector<8x64xf32>
    %9 = arith.truncf %8 : vector<8x64xf32> to vector<8x64xbf16>
    %c0_6 = arith.constant 0 : index
    %c0_7 = arith.constant 0 : index
    %10 = vector.load %arg4[%c0_6, %c0_7] : memref<64x16xbf16, #tpu.memory_space<vmem>>, vector<64x16xbf16>
    %cst_8 = arith.constant dense<0.000000e+00> : vector<8x16xf32>
    %11 = tpu.matmul %9, %10, %cst_8 {dimension_numbers = #tpu.dot_dimension_numbers<[1], [0], [0], [1], [0, 0, 1, 1], [], []>} : vector<8x64xbf16>, vector<64x16xbf16>, vector<8x16xf32> -> vector<8x16xf32>
    %c0_9 = arith.constant 0 : index
    %c0_10 = arith.constant 0 : index
    %12 = vector.load %arg5[%c0_9, %c0_10] : memref<1x16xf32, #tpu.memory_space<vmem>>, vector<1x16xf32>
    %13 = vector.broadcast %12 : vector<1x16xf32> to vector<8x16xf32>
    %14 = arith.addf %11, %13 : vector<8x16xf32>
    %c0_11 = arith.constant 0 : index
    %c0_12 = arith.constant 0 : index
    %15 = vector.load %arg6[%c0_11, %c0_12] : memref<8x16xf32, #tpu.memory_space<vmem>>, vector<8x16xf32>
    tpu.vector_store %arg6[%c0_11, %c0_12], %14 {strides = array<i32>} : memref<8x16xf32, #tpu.memory_space<vmem>>, vector<8x16xf32>,
    return
  }
  func.func @transform_0(%arg0: i32) -> (i32, i32) {
    %c0_i32 = arith.constant 0 : i32
    %c0_i32_0 = arith.constant 0 : i32
    return %arg0, %c0_i32 : i32, i32
  }
  func.func @transform_1(%arg0: i32) -> (i32, i32) {
    %c0_i32 = arith.constant 0 : i32
    %c0_i32_0 = arith.constant 0 : i32
    %c0_i32_1 = arith.constant 0 : i32
    return %c0_i32, %c0_i32_0 : i32, i32
  }
  func.func @transform_2(%arg0: i32) -> (i32, i32) {
    %c0_i32 = arith.constant 0 : i32
    %c0_i32_0 = arith.constant 0 : i32
    %c0_i32_1 = arith.constant 0 : i32
    return %c0_i32, %c0_i32_0 : i32, i32
  }
  func.func @transform_3(%arg0: i32) -> (i32, i32) {
    %c0_i32 = arith.constant 0 : i32
    %c0_i32_0 = arith.constant 0 : i32
    %c0_i32_1 = arith.constant 0 : i32
    return %c0_i32, %c0_i32_0 : i32, i32
  }
  func.func @transform_4(%arg0: i32) -> (i32, i32) {
    %c0_i32 = arith.constant 0 : i32
    %c0_i32_0 = arith.constant 0 : i32
    %c0_i32_1 = arith.constant 0 : i32
    return %c0_i32, %c0_i32_0 : i32, i32
  }
  func.func @transform_5(%arg0: i32) -> (i32, i32) {
    %c0_i32 = arith.constant 0 : i32
    %c0_i32_0 = arith.constant 0 : i32
    return %arg0, %c0_i32 : i32, i32
  }
}

</mosaic_0001>

<bundles_post_ra>
// kernel: tpu_custom_call.1
= control target key start
LH: loop header
LB: loop body
LE: loop exit
PB: predicated region body
PF: predicated region fallthrough
CT: control target
= control target key end

     0   :  { %10 = vsyncpa [#allocation3], 0  ;;  %s563_s0 = inlined_call_operand.hbm [shape: f32[8,32], index: 0, kind: input, shape index: {}]   ;;  %s564_s1 = inlined_call_operand.hbm [shape: bf16[32,64], index: 1, kind: input, shape index: {}]   ;;  %s565_s2 = inlined_call_operand.hbm [shape: f32[1,64], index: 2, kind: input, shape index: {}]   ;;  %s566_s3 = inlined_call_operand.hbm [shape: bf16[64,16], index: 3, kind: input, shape index: {}]   ;;  %s567_s4 = inlined_call_operand.hbm [shape: f32[1,16], index: 4, kind: input, shape index: {}]   ;;  %s568_s5 = inlined_call_operand.hbm [shape: f32[8,16], index: 5, kind: output, shape index: {}]  }
   0x1   :  { %11 = vsyncpa [#allocation6], 0 }
   0x2   :  { %12 = vsyncpa [#allocation9], 0 }
   0x3   :  { %13 = vsyncpa [#allocation4], 0  ;;  %s451_s18 = smov [#allocation5]   ;;  %s311_s22 = scalar_lea.hbm %s564_s1, 256 }
   0x4   :  { %s29_s19 = sshll.u32 %s451_s18, 4  ;;  %p312_p0 = scmp.ne.s32.totalorder %s564_s1, %s311_s22  ;;  %s30_s19 = int_to_ptr.vmem [resolvable:$true] %s29_s19 }
   0x5   :  { %p315_p1 = scmp.lt.u32.totalorder %s311_s22, %s564_s1 }
   0x7   :  { %p317_p2 = pnand %p315_p1, %p312_p0 }
   0x9   :  { %320 = shalt.err (!%p317_p2)
}
   0xa   :  { %s321_s27 = scalar_lea.vmem %s30_s19, 256  ;;  %p326_p4 = scmp.lt.s32.totalorder %s30_s19, %s30_s19 }
   0xb   :  { %p322_p3 = scmp.ne.s32.totalorder %s30_s19, %s321_s27  ;;  %p327_p5 = scmp.lt.s32.totalorder %s321_s27, %s321_s27 }
   0xd   :  { %p328_p6 = por %p327_p5, %p326_p4 }
   0xf   :  { %p329_p7 = pnand %p328_p6, %p322_p3 }
  0x11   :  { %332 = shalt.err (!%p329_p7)
}
  0x12   :  { %s452_s28 = smov 64   ;;  %s453_s29 = smov 4  }
  0x13   :  { %35 = dma.hbm_to_vmem [thread:$0]  %s564_s1, 256, %s30_s19, [#allocation6], %s452_s28, %s452_s28, %s453_s29  }
  0x14   :  { %s454_s7 = smov [#allocation8]   ;;  %s455_s9 = smov [#allocation2]  }
  0x15   :  { %s51_s8 = sshll.u32 %s454_s7, 4  ;;  %s20_s10 = sshll.u32 %s455_s9, 4  ;;  %s52_s8 = int_to_ptr.vmem [resolvable:$true] %s51_s8  ;;  %s21_s10 = int_to_ptr.vmem [resolvable:$true] %s20_s10 }
  0x16   :  { %s333_s13 = scalar_lea.hbm %s566_s3, 512 }
  0x17   :  { %p334_p8 = scmp.ne.s32.totalorder %s566_s3, %s333_s13  ;;  %p337_p9 = scmp.lt.u32.totalorder %s333_s13, %s566_s3 }
  0x19   :  { %p339_p10 = pnand %p337_p9, %p334_p8 }
  0x1b   :  { %342 = shalt.err (!%p339_p10)
}
  0x1c   :  { %s343_s1 = scalar_lea.vmem %s52_s8, 512  ;;  %p348_p12 = scmp.lt.s32.totalorder %s52_s8, %s52_s8 }
  0x1d   :  { %p344_p11 = scmp.ne.s32.totalorder %s52_s8, %s343_s1  ;;  %p349_p13 = scmp.lt.s32.totalorder %s343_s1, %s343_s1 }
  0x1f   :  { %p350_p0 = por %p349_p13, %p348_p12 }
  0x21   :  { %p351_p1 = pnand %p350_p0, %p344_p11 }
  0x23   :  { %354 = shalt.err (!%p351_p1)
}
  0x24   :  { %57 = dma.hbm_to_vmem [thread:$0]  %s566_s3, 512, %s52_s8, [#allocation9], %s452_s28, %s452_s28, %s453_s29  }
  0x25   :  { %s355_s22 = scalar_lea.hbm %s563_s0, 128 }
  0x26   :  { %p356_p2 = scmp.ne.s32.totalorder %s563_s0, %s355_s22  ;;  %p359_p3 = scmp.lt.u32.totalorder %s355_s22, %s563_s0 }
  0x28   :  { %p361_p4 = pnand %p359_p3, %p356_p2 }
  0x2a   :  { %364 = shalt.err (!%p361_p4)
}
  0x2b   :  { %s365_s27 = scalar_lea.vmem %s21_s10, 128  ;;  %p370_p6 = scmp.lt.s32.totalorder %s21_s10, %s21_s10 }
  0x2c   :  { %p366_p5 = scmp.ne.s32.totalorder %s21_s10, %s365_s27  ;;  %p371_p7 = scmp.lt.s32.totalorder %s365_s27, %s365_s27 }
  0x2e   :  { %p372_p8 = por %p371_p7, %p370_p6 }
  0x30   :  { %p373_p9 = pnand %p372_p8, %p366_p5 }
  0x32   :  { %376 = shalt.err (!%p373_p9)
}
  0x33   :  { %23 = dma.hbm_to_vmem [thread:$0]  %s563_s0, 128, %s21_s10, [#allocation3]  }
  0x34   :  { %s456_s29 = smov [#allocation7]   ;;  %s457_s6 = smov [#allocation10]  }
  0x35   :  { %s42_s30 = sshll.u32 %s456_s29, 4  ;;  %s64_s7 = sshll.u32 %s457_s6, 4  ;;  %s43_s30 = int_to_ptr.vmem [resolvable:$true] %s42_s30  ;;  %s65_s7 = int_to_ptr.vmem [resolvable:$true] %s64_s7 }
  0x36   :  { %s377_s11 = scalar_lea.hbm %s565_s2, 16 }
  0x37   :  { %p378_p10 = scmp.ne.s32.totalorder %s565_s2, %s377_s11  ;;  %p381_p11 = scmp.lt.u32.totalorder %s377_s11, %s565_s2 }
  0x39   :  { %p383_p12 = pnand %p381_p11, %p378_p10 }
  0x3b   :  { %386 = shalt.err (!%p383_p12)
}
  0x3c   :  { %s387_s0 = scalar_lea.vmem %s43_s30, 16  ;;  %s391_s10 = scalar_lea.vmem %s43_s30, 32 }
  0x3d   :  { %p388_p13 = scmp.ne.s32.totalorder %s43_s30, %s387_s0  ;;  %p392_p0 = scmp.lt.s32.totalorder %s43_s30, %s43_s30 }
  0x3e   :  { %p393_p1 = scmp.lt.s32.totalorder %s391_s10, %s387_s0 }
  0x40   :  { %p394_p2 = por %p393_p1, %p392_p0 }
  0x42   :  { %p395_p3 = pnand %p394_p2, %p388_p13 }
  0x44   :  { %398 = shalt.err (!%p395_p3)
}
  0x45   :  { %45 = dma.hbm_to_vmem [thread:$0]  %s565_s2, 16, %s43_s30, [#allocation6]  }
  0x46   :  { %s399_s19 = scalar_lea.hbm %s567_s4, 16 }
  0x47   :  { %p400_p4 = scmp.ne.s32.totalorder %s567_s4, %s399_s19  ;;  %p403_p5 = scmp.lt.u32.totalorder %s399_s19, %s567_s4 }
  0x49   :  { %p405_p6 = pnand %p403_p5, %p400_p4 }
  0x4b   :  { %408 = shalt.err (!%p405_p6)
}
  0x4c   :  { %s409_s24 = scalar_lea.vmem %s65_s7, 16  ;;  %s413_s25 = scalar_lea.vmem %s65_s7, 32 }
  0x4d   :  { %p410_p7 = scmp.ne.s32.totalorder %s65_s7, %s409_s24  ;;  %p414_p8 = scmp.lt.s32.totalorder %s65_s7, %s65_s7 }
  0x4e   :  { %p415_p9 = scmp.lt.s32.totalorder %s413_s25, %s409_s24 }
  0x50   :  { %p416_p10 = por %p415_p9, %p414_p8 }
  0x52   :  { %p417_p11 = pnand %p416_p10, %p410_p7 }
  0x54   :  { %420 = shalt.err (!%p417_p11)
}
  0x55   :  { %67 = dma.hbm_to_vmem [thread:$0]  %s567_s4, 16, %s65_s7, [#allocation9]  }
  0x56   :  { %443 = dma.done.wait [#allocation3], 128  }
  0x57   :  { %444 = vsyncadd [#allocation3], 4294967168 }
  0x58   :  { %445 = dma.done.wait [#allocation6], 272  }
  0x59   :  { %446 = vsyncadd [#allocation6], 4294967024 }
  0x5a   :  { %447 = dma.done.wait [#allocation9], 528  }
  0x5b   :  { %448 = vsyncadd [#allocation9], 4294966768  ;;  %v458_v0 = vmov 0.0   ;;  %vm459_vm0 = vmmov 0   ;;  %v305_v1 = vld [vmem:[#allocation5] sm:$0xff]   ;;  %v306_v2 = vld [vmem:[#allocation5 + $0x8] sm:$0xff]  }
  0x5c   :  { %275 = vmatprep.subr.bf16.mxu0 %v458_v0  ;;  %279 = vmatprep.mubr.msk.bf16.mxu0 %vm459_vm0, %v458_v0  ;;  %v84_v3 = vld [vmem:[#allocation2] sm:$0xff]  ;;  %vm109_vm1 = vcmask 261120   ;;  %v309_v7 = vld [vmem:[#allocation8 + $0x10] sm:$0xff]   ;;  %v310_v8 = vld [vmem:[#allocation8 + $0x18] sm:$0xff]   ;;  %vm194_vm2 = vcmask 523264   ;;  %s460_s4 = smov [#allocation11]  }
  0x5d   :  { %283 = vmatprep.subr.bf16.mxu1 %v458_v0  ;;  %291 = vmatprep.mubr.msk.bf16.mxu1 %vm459_vm0, %v458_v0  ;;  %v307_v4 = vld [vmem:[#allocation8] sm:$0xff]   ;;  %v308_v5 = vld [vmem:[#allocation8 + $0x8] sm:$0xff]   ;;  %v85_v6 = vpack.c.bf16 %v84_v3, %v84_v3  ;;  %v257_v9 = vld [vmem:[#allocation7] ss:$0 sm:$0xff]  ;;  %s246_s27 = sshll.u32 %s460_s4, 4  ;;  %vm238_vm3 = vcmask 130048   ;;  %s247_s27 = int_to_ptr.vmem [resolvable:$true] %s246_s27 }
  0x5e   :  { %276 = vmatpush3.bf16.msra.mxu0 %v305_v1  ;;  %284 = vmatpush3.bf16.msra.mxu1 %v307_v4  ;;  %v261_v17 = vld [vmem:[#allocation10] ss:$0 sm:$0xff]  ;;  %s421_s3 = scalar_lea.vmem %s247_s27, 128  ;;  %p426_p13 = scmp.lt.s32.totalorder %s247_s27, %s247_s27 }
  0x5f   :  { %277 = vmatprep.subr.bf16.mxu0 %v458_v0  ;;  %285 = vmatprep.subr.bf16.mxu1 %v458_v0  ;;  %p422_p12 = scmp.ne.s32.totalorder %s247_s27, %s421_s3  ;;  %p427_p0 = scmp.lt.s32.totalorder %s421_s3, %s421_s3 }
  0x61   :  { %p428_p1 = por %p427_p0, %p426_p13 }
  0x62   :  { %278 = vmatpush3.bf16.msra.mxu0 %v306_v2  ;;  %286 = vmatpush3.bf16.msra.mxu1 %v308_v5 }
  0x63   :  { %287 = vmatprep.subr.bf16.mxu1 %v458_v0  ;;  %p429_p2 = pnand %p428_p1, %p422_p12 }
  0x65   :  { %280 = vmatmul.mubr.msk.bf16.vlgmr.msra.gmra.mrb[0].mxu0 %vm109_vm1, %v85_v6 }
  0x66   :  { %288 = vmatpush3.bf16.msra.mxu1 %v309_v7 }
  0x67   :  { %289 = vmatprep.subr.bf16.mxu1 %v458_v0 }
  0x6a   :  { %290 = vmatpush3.bf16.msra.mxu1 %v310_v8 }
 0x138   :  { %v147_v10 = vpop.f32.mrb[0].mxu0 }
 0x139   :  { %v148_v11 = vadd.f32 %v257_v9, %v147_v10  ;;  %v281_v12 = vpop.f32.mrb[1].mxu0 }
 0x13a   :  { %v150_v13 = vpop.f32.mrb[2].mxu0 }
 0x13b   :  { %v153_v14 = vmax.f32 %v148_v11, 0.0  ;;  %v282_v15 = vpop.f32.mrb[3].mxu0 }
 0x13d   :  { %v154_v16 = vpack.c.bf16 %v153_v14, %v153_v14 }
 0x13f   :  { %292 = vmatmul.mubr.msk.bf16.vlgmr.msra.gmra.mrb[0].mxu1 %vm194_vm2, %v154_v16 }
 0x212   :  { %v232_v18 = vpop.f32.mrb[0].mxu1 }
 0x213   :  { %v233_v19 = vadd.f32 %v261_v17, %v232_v18  ;;  %v293_v20 = vpop.f32.mrb[1].mxu1 }
 0x214   :  { %v235_v21 = vpop.f32.mrb[2].mxu1 }
 0x215   :  { %v294_v22 = vpop.f32.mrb[3].mxu1  ;;  %239 = vst.msk [vmem:[#allocation11] sm:$0xff] %vm238_vm3, %v233_v19 }
 0x216   :  { %432 = shalt.err (!%p429_p2)
}
 0x217   :  { %s433_s30 = scalar_lea.hbm %s568_s5, 128 }
 0x218   :  { %p434_p3 = scmp.ne.s32.totalorder %s568_s5, %s433_s30  ;;  %p437_p4 = scmp.lt.u32.totalorder %s433_s30, %s568_s5 }
 0x21a   :  { %p439_p5 = pnand %p437_p4, %p434_p3 }
 0x21c   :  { %442 = shalt.err (!%p439_p5)
}
 0x21d   :  { %249 = dma.vmem_to_hbm [thread:$0]  %s247_s27, 128, %s568_s5, [#allocation4]  }
 0x21e   :  { %449 = dma.done.wait [#allocation4], 128  }
 0x21f   :  { %450 = vsyncadd [#allocation4], 4294967168 }
 0x220   :  { %253 = vsyncpa [#allocation3], 1 }
 0x221   :  { %254 = vsyncpa [#allocation6], 1 }
 0x222   :  { %255 = vsyncpa [#allocation9], 1 }
 0x223   :  { %256 = vsyncpa [#allocation4], 1 }

// kernel: tpu_custom_call.1
= control target key start
LH: loop header
LB: loop body
LE: loop exit
PB: predicated region body
PF: predicated region fallthrough
CT: control target
= control target key end

     0   :  { %10 = vsyncpa [#allocation3], 0  ;;  %s563_s0 = inlined_call_operand.hbm [shape: f32[8,32], index: 0, kind: input, shape index: {}]   ;;  %s564_s1 = inlined_call_operand.hbm [shape: bf16[32,64], index: 1, kind: input, shape index: {}]   ;;  %s565_s2 = inlined_call_operand.hbm [shape: f32[1,64], index: 2, kind: input, shape index: {}]   ;;  %s566_s3 = inlined_call_operand.hbm [shape: bf16[64,16], index: 3, kind: input, shape index: {}]   ;;  %s567_s4 = inlined_call_operand.hbm [shape: f32[1,16], index: 4, kind: input, shape index: {}]   ;;  %s568_s5 = inlined_call_operand.hbm [shape: f32[8,16], index: 5, kind: output, shape index: {}]  }
   0x1   :  { %11 = vsyncpa [#allocation6], 0 }
   0x2   :  { %12 = vsyncpa [#allocation9], 0 }
   0x3   :  { %13 = vsyncpa [#allocation4], 0  ;;  %s451_s18 = smov [#allocation5]   ;;  %s311_s22 = scalar_lea.hbm %s564_s1, 256 }
   0x4   :  { %s29_s19 = sshll.u32 %s451_s18, 4  ;;  %p312_p0 = scmp.ne.s32.totalorder %s564_s1, %s311_s22  ;;  %s30_s19 = int_to_ptr.vmem [resolvable:$true] %s29_s19 }
   0x5   :  { %p315_p1 = scmp.lt.u32.totalorder %s311_s22, %s564_s1 }
   0x7   :  { %p317_p2 = pnand %p315_p1, %p312_p0 }
   0x9   :  { %320 = shalt.err (!%p317_p2)
}
   0xa   :  { %s321_s27 = scalar_lea.vmem %s30_s19, 256  ;;  %p326_p4 = scmp.lt.s32.totalorder %s30_s19, %s30_s19 }
   0xb   :  { %p322_p3 = scmp.ne.s32.totalorder %s30_s19, %s321_s27  ;;  %p327_p5 = scmp.lt.s32.totalorder %s321_s27, %s321_s27 }
   0xd   :  { %p328_p6 = por %p327_p5, %p326_p4 }
   0xf   :  { %p329_p7 = pnand %p328_p6, %p322_p3 }
  0x11   :  { %332 = shalt.err (!%p329_p7)
}
  0x12   :  { %s452_s28 = smov 64   ;;  %s453_s29 = smov 4  }
  0x13   :  { %35 = dma.hbm_to_vmem [thread:$0]  %s564_s1, 256, %s30_s19, [#allocation6], %s452_s28, %s452_s28, %s453_s29  }
  0x14   :  { %s454_s7 = smov [#allocation8]   ;;  %s455_s9 = smov [#allocation2]  }
  0x15   :  { %s51_s8 = sshll.u32 %s454_s7, 4  ;;  %s20_s10 = sshll.u32 %s455_s9, 4  ;;  %s52_s8 = int_to_ptr.vmem [resolvable:$true] %s51_s8  ;;  %s21_s10 = int_to_ptr.vmem [resolvable:$true] %s20_s10 }
  0x16   :  { %s333_s13 = scalar_lea.hbm %s566_s3, 512 }
  0x17   :  { %p334_p8 = scmp.ne.s32.totalorder %s566_s3, %s333_s13  ;;  %p337_p9 = scmp.lt.u32.totalorder %s333_s13, %s566_s3 }
  0x19   :  { %p339_p10 = pnand %p337_p9, %p334_p8 }
  0x1b   :  { %342 = shalt.err (!%p339_p10)
}
  0x1c   :  { %s343_s1 = scalar_lea.vmem %s52_s8, 512  ;;  %p348_p12 = scmp.lt.s32.totalorder %s52_s8, %s52_s8 }
  0x1d   :  { %p344_p11 = scmp.ne.s32.totalorder %s52_s8, %s343_s1  ;;  %p349_p13 = scmp.lt.s32.totalorder %s343_s1, %s343_s1 }
  0x1f   :  { %p350_p0 = por %p349_p13, %p348_p12 }
  0x21   :  { %p351_p1 = pnand %p350_p0, %p344_p11 }
  0x23   :  { %354 = shalt.err (!%p351_p1)
}
  0x24   :  { %57 = dma.hbm_to_vmem [thread:$0]  %s566_s3, 512, %s52_s8, [#allocation9], %s452_s28, %s452_s28, %s453_s29  }
  0x25   :  { %s355_s22 = scalar_lea.hbm %s563_s0, 128 }
  0x26   :  { %p356_p2 = scmp.ne.s32.totalorder %s563_s0, %s355_s22  ;;  %p359_p3 = scmp.lt.u32.totalorder %s355_s22, %s563_s0 }
  0x28   :  { %p361_p4 = pnand %p359_p3, %p356_p2 }
  0x2a   :  { %364 = shalt.err (!%p361_p4)
}
  0x2b   :  { %s365_s27 = scalar_lea.vmem %s21_s10, 128  ;;  %p370_p6 = scmp.lt.s32.totalorder %s21_s10, %s21_s10 }
  0x2c   :  { %p366_p5 = scmp.ne.s32.totalorder %s21_s10, %s365_s27  ;;  %p371_p7 = scmp.lt.s32.totalorder %s365_s27, %s365_s27 }
  0x2e   :  { %p372_p8 = por %p371_p7, %p370_p6 }
  0x30   :  { %p373_p9 = pnand %p372_p8, %p366_p5 }
  0x32   :  { %376 = shalt.err (!%p373_p9)
}
  0x33   :  { %23 = dma.hbm_to_vmem [thread:$0]  %s563_s0, 128, %s21_s10, [#allocation3]  }
  0x34   :  { %s456_s29 = smov [#allocation7]   ;;  %s457_s6 = smov [#allocation10]  }
  0x35   :  { %s42_s30 = sshll.u32 %s456_s29, 4  ;;  %s64_s7 = sshll.u32 %s457_s6, 4  ;;  %s43_s30 = int_to_ptr.vmem [resolvable:$true] %s42_s30  ;;  %s65_s7 = int_to_ptr.vmem [resolvable:$true] %s64_s7 }
  0x36   :  { %s377_s11 = scalar_lea.hbm %s565_s2, 16 }
  0x37   :  { %p378_p10 = scmp.ne.s32.totalorder %s565_s2, %s377_s11  ;;  %p381_p11 = scmp.lt.u32.totalorder %s377_s11, %s565_s2 }
  0x39   :  { %p383_p12 = pnand %p381_p11, %p378_p10 }
  0x3b   :  { %386 = shalt.err (!%p383_p12)
}
  0x3c   :  { %s387_s0 = scalar_lea.vmem %s43_s30, 16  ;;  %s391_s10 = scalar_lea.vmem %s43_s30, 32 }
  0x3d   :  { %p388_p13 = scmp.ne.s32.totalorder %s43_s30, %s387_s0  ;;  %p392_p0 = scmp.lt.s32.totalorder %s43_s30, %s43_s30 }
  0x3e   :  { %p393_p1 = scmp.lt.s32.totalorder %s391_s10, %s387_s0 }
  0x40   :  { %p394_p2 = por %p393_p1, %p392_p0 }
  0x42   :  { %p395_p3 = pnand %p394_p2, %p388_p13 }
  0x44   :  { %398 = shalt.err (!%p395_p3)
}
  0x45   :  { %45 = dma.hbm_to_vmem [thread:$0]  %s565_s2, 16, %s43_s30, [#allocation6]  }
  0x46   :  { %s399_s19 = scalar_lea.hbm %s567_s4, 16 }
  0x47   :  { %p400_p4 = scmp.ne.s32.totalorder %s567_s4, %s399_s19  ;;  %p403_p5 = scmp.lt.u32.totalorder %s399_s19, %s567_s4 }
  0x49   :  { %p405_p6 = pnand %p403_p5, %p400_p4 }
  0x4b   :  { %408 = shalt.err (!%p405_p6)
}
  0x4c   :  { %s409_s24 = scalar_lea.vmem %s65_s7, 16  ;;  %s413_s25 = scalar_lea.vmem %s65_s7, 32 }
  0x4d   :  { %p410_p7 = scmp.ne.s32.totalorder %s65_s7, %s409_s24  ;;  %p414_p8 = scmp.lt.s32.totalorder %s65_s7, %s65_s7 }
  0x4e   :  { %p415_p9 = scmp.lt.s32.totalorder %s413_s25, %s409_s24 }
  0x50   :  { %p416_p10 = por %p415_p9, %p414_p8 }
  0x52   :  { %p417_p11 = pnand %p416_p10, %p410_p7 }
  0x54   :  { %420 = shalt.err (!%p417_p11)
}
  0x55   :  { %67 = dma.hbm_to_vmem [thread:$0]  %s567_s4, 16, %s65_s7, [#allocation9]  }
  0x56   :  { %443 = dma.done.wait [#allocation3], 128  }
  0x57   :  { %444 = vsyncadd [#allocation3], 4294967168 }
  0x58   :  { %445 = dma.done.wait [#allocation6], 272  }
  0x59   :  { %446 = vsyncadd [#allocation6], 4294967024 }
  0x5a   :  { %447 = dma.done.wait [#allocation9], 528  }
  0x5b   :  { %448 = vsyncadd [#allocation9], 4294966768  ;;  %v458_v0 = vmov 0.0   ;;  %vm459_vm0 = vmmov 0   ;;  %v305_v1 = vld [vmem:[#allocation5] sm:$0xff]   ;;  %v306_v2 = vld [vmem:[#allocation5 + $0x8] sm:$0xff]  }
  0x5c   :  { %275 = vmatprep.subr.bf16.mxu0 %v458_v0  ;;  %279 = vmatprep.mubr.msk.bf16.mxu0 %vm459_vm0, %v458_v0  ;;  %v84_v3 = vld [vmem:[#allocation2] sm:$0xff]  ;;  %vm109_vm1 = vcmask 261120   ;;  %v309_v7 = vld [vmem:[#allocation8 + $0x10] sm:$0xff]   ;;  %v310_v8 = vld [vmem:[#allocation8 + $0x18] sm:$0xff]   ;;  %vm194_vm2 = vcmask 523264   ;;  %s460_s4 = smov [#allocation11]  }
  0x5d   :  { %283 = vmatprep.subr.bf16.mxu1 %v458_v0  ;;  %291 = vmatprep.mubr.msk.bf16.mxu1 %vm459_vm0, %v458_v0  ;;  %v307_v4 = vld [vmem:[#allocation8] sm:$0xff]   ;;  %v308_v5 = vld [vmem:[#allocation8 + $0x8] sm:$0xff]   ;;  %v85_v6 = vpack.c.bf16 %v84_v3, %v84_v3  ;;  %v257_v9 = vld [vmem:[#allocation7] ss:$0 sm:$0xff]  ;;  %s246_s27 = sshll.u32 %s460_s4, 4  ;;  %vm238_vm3 = vcmask 130048   ;;  %s247_s27 = int_to_ptr.vmem [resolvable:$true] %s246_s27 }
  0x5e   :  { %276 = vmatpush3.bf16.msra.mxu0 %v305_v1  ;;  %284 = vmatpush3.bf16.msra.mxu1 %v307_v4  ;;  %v261_v17 = vld [vmem:[#allocation10] ss:$0 sm:$0xff]  ;;  %s421_s3 = scalar_lea.vmem %s247_s27, 128  ;;  %p426_p13 = scmp.lt.s32.totalorder %s247_s27, %s247_s27 }
  0x5f   :  { %277 = vmatprep.subr.bf16.mxu0 %v458_v0  ;;  %285 = vmatprep.subr.bf16.mxu1 %v458_v0  ;;  %p422_p12 = scmp.ne.s32.totalorder %s247_s27, %s421_s3  ;;  %p427_p0 = scmp.lt.s32.totalorder %s421_s3, %s421_s3 }
  0x61   :  { %p428_p1 = por %p427_p0, %p426_p13 }
  0x62   :  { %278 = vmatpush3.bf16.msra.mxu0 %v306_v2  ;;  %286 = vmatpush3.bf16.msra.mxu1 %v308_v5 }
  0x63   :  { %287 = vmatprep.subr.bf16.mxu1 %v458_v0  ;;  %p429_p2 = pnand %p428_p1, %p422_p12 }
  0x65   :  { %280 = vmatmul.mubr.msk.bf16.vlgmr.msra.gmra.mrb[0].mxu0 %vm109_vm1, %v85_v6 }
  0x66   :  { %288 = vmatpush3.bf16.msra.mxu1 %v309_v7 }
  0x67   :  { %289 = vmatprep.subr.bf16.mxu1 %v458_v0 }
  0x6a   :  { %290 = vmatpush3.bf16.msra.mxu1 %v310_v8 }
 0x138   :  { %v147_v10 = vpop.f32.mrb[0].mxu0 }
 0x139   :  { %v148_v11 = vadd.f32 %v257_v9, %v147_v10  ;;  %v281_v12 = vpop.f32.mrb[1].mxu0 }
 0x13a   :  { %v150_v13 = vpop.f32.mrb[2].mxu0 }
 0x13b   :  { %v153_v14 = vmax.f32 %v148_v11, 0.0  ;;  %v282_v15 = vpop.f32.mrb[3].mxu0 }
 0x13d   :  { %v154_v16 = vpack.c.bf16 %v153_v14, %v153_v14 }
 0x13f   :  { %292 = vmatmul.mubr.msk.bf16.vlgmr.msra.gmra.mrb[0].mxu1 %vm194_vm2, %v154_v16 }
 0x212   :  { %v232_v18 = vpop.f32.mrb[0].mxu1 }
 0x213   :  { %v233_v19 = vadd.f32 %v261_v17, %v232_v18  ;;  %v293_v20 = vpop.f32.mrb[1].mxu1 }
 0x214   :  { %v235_v21 = vpop.f32.mrb[2].mxu1 }
 0x215   :  { %v294_v22 = vpop.f32.mrb[3].mxu1  ;;  %239 = vst.msk [vmem:[#allocation11] sm:$0xff] %vm238_vm3, %v233_v19 }
 0x216   :  { %432 = shalt.err (!%p429_p2)
}
 0x217   :  { %s433_s30 = scalar_lea.hbm %s568_s5, 128 }
 0x218   :  { %p434_p3 = scmp.ne.s32.totalorder %s568_s5, %s433_s30  ;;  %p437_p4 = scmp.lt.u32.totalorder %s433_s30, %s568_s5 }
 0x21a   :  { %p439_p5 = pnand %p437_p4, %p434_p3 }
 0x21c   :  { %442 = shalt.err (!%p439_p5)
}
 0x21d   :  { %249 = dma.vmem_to_hbm [thread:$0]  %s247_s27, 128, %s568_s5, [#allocation4]  }
 0x21e   :  { %449 = dma.done.wait [#allocation4], 128  }
 0x21f   :  { %450 = vsyncadd [#allocation4], 4294967168 }
 0x220   :  { %253 = vsyncpa [#allocation3], 1 }
 0x221   :  { %254 = vsyncpa [#allocation6], 1 }
 0x222   :  { %255 = vsyncpa [#allocation9], 1 }
 0x223   :  { %256 = vsyncpa [#allocation4], 1 }

</bundles_post_ra>
